<compile_context>
chip_gen: v7x
topology: tpu7x:2x2x1
jax: 0.10.0
libtpu: 0.0.40
codegen_flags: <defaults>
</compile_context>

<pallas_src>
import jax
import jax.numpy as jnp
from jax import lax
from jax.experimental import pallas as pl
from jax.experimental.pallas import tpu as pltpu


def _linear_kernel(x_ref, w_ref, b_ref, o_ref):
    # x_ref: [TM, D_in], w_ref: [D_out_p, D_in] (PyTorch layout), b_ref: [1, D_out_p]
    acc = lax.dot_general(
        x_ref[...],
        w_ref[...],
        dimension_numbers=(((1,), (1,)), ((), ())),  # contract D_in with D_in
        preferred_element_type=jnp.float32,
    )
    o_ref[...] = (acc + b_ref[...]).astype(o_ref.dtype)


def initial_feature_transform(x, weight, bias, *, tm_max=512):
    """Pallas equivalent of nn.Linear(input_dim, output_dim) on the last dim.

    x      : [..., D_in]
    weight : [D_out, D_in]   (PyTorch convention, consumed as-is)
    bias   : [D_out]
    """
    orig_shape = x.shape
    d_in = orig_shape[-1]
    d_out = weight.shape[0]
    itemsize = jnp.dtype(x.dtype).itemsize

    # --- flatten leading dims (free reshape) ---
    x2d = x.reshape(-1, d_in)
    n = x2d.shape[0]

    # --- lane-dense output: pad D_out up to a multiple of 128 ---
    d_out_p = ((d_out + 127) // 128) * 128
    if d_out_p != d_out:
        weight = jnp.pad(weight, ((0, d_out_p - d_out), (0, 0)))
        bias = jnp.pad(bias, (0, d_out_p - d_out))
    b2d = bias.reshape(1, d_out_p)

    # --- row tile: multiple of 8 sublanes, capped at tm_max; pad N to a multiple ---
    tm = min(tm_max, ((n + 7) // 8) * 8)
    n_pad = pl.cdiv(n, tm) * tm
    if n_pad != n:
        x2d = jnp.pad(x2d, ((0, n_pad - n), (0, 0)))
    grid = (n_pad // tm,)

    # --- VMEM budget: double-buffered x/out tiles + resident weight/bias ---
    vmem_bytes = (
        2 * tm * d_in * itemsize          # x tiles (double-buffered)
        + 2 * tm * d_out_p * itemsize     # out tiles (double-buffered)
        + 2 * d_out_p * d_in * itemsize   # weight buffers
        + 2 * d_out_p * itemsize          # bias buffers
    )
    vmem_limit = int(min(64 * 1024 * 1024, max(vmem_bytes * 2, 8 * 1024 * 1024)))

    cost = pl.CostEstimate(
        flops=2 * n_pad * d_in * d_out_p,
        transcendentals=0,
        bytes_accessed=(n_pad * d_in + d_out_p * d_in + d_out_p + n_pad * d_out_p)
        * itemsize,
    )

    out2d = pl.pallas_call(
        _linear_kernel,
        out_shape=jax.ShapeDtypeStruct((n_pad, d_out_p), x.dtype),
        grid=grid,
        in_specs=[
            pl.BlockSpec((tm, d_in), lambda i: (i, 0)),         # streamed rows
            pl.BlockSpec((d_out_p, d_in), lambda i: (0, 0)),    # resident weight
            pl.BlockSpec((1, d_out_p), lambda i: (0, 0)),       # resident bias
        ],
        out_specs=pl.BlockSpec((tm, d_out_p), lambda i: (i, 0)),
        compiler_params=pltpu.CompilerParams(
            dimension_semantics=("parallel",),   # shard rows across TCs on v7x
            vmem_limit_bytes=vmem_limit,
        ),
        cost_estimate=cost,
    )(x2d, weight, b2d)

    out2d = out2d[:n, :d_out]
    return out2d.reshape(*orig_shape[:-1], d_out)


def _reference(x, weight, bias):
    return jnp.einsum("...i,oi->...o", x, weight) + bias


if __name__ == "__main__":
    key = jax.random.PRNGKey(0)
    k_x, k_w, k_b = jax.random.split(key, 3)

    batch, seq, input_dim, output_dim = 2, 8, 32, 64

    # Deterministic parameter init (mimicking nn.Linear's uniform init range).
    bound = 1.0 / (input_dim ** 0.5)
    weight = jax.random.uniform(
        k_w, (output_dim, input_dim), jnp.float32, -bound, bound
    )
    bias = jax.random.uniform(k_b, (output_dim,), jnp.float32, -bound, bound)

    x = jax.random.normal(k_x, (batch, seq, input_dim), jnp.float32)

    out = initial_feature_transform(x, weight, bias)
    out = jax.block_until_ready(out)

    ref = _reference(x, weight, bias)
    assert out.shape == (batch, seq, output_dim)
    assert jnp.allclose(out, ref, atol=1e-5, rtol=1e-5)

    print("KERNEL_OK")
</pallas_src>

<mosaic_0001>
module attributes {stable_mosaic.version = 11 : i64} {
  func.func @_linear_kernel(%arg0: i32, %arg1: memref<16x32xf32, #tpu.memory_space<vmem>>, %arg2: memref<128x32xf32, #tpu.memory_space<vmem>>, %arg3: memref<1x128xf32, #tpu.memory_space<vmem>>, %arg4: memref<16x128xf32, #tpu.memory_space<vmem>>) attributes {dimension_semantics = [#tpu.dimension_semantics<parallel>], iteration_bounds = array<i64: 1>, scalar_prefetch = 0 : i64, scratch_operands = 0 : i64, tpu.core_type = #tpu.core_type<tc>, window_params = [{transform_indices = @transform_0, window_bounds = array<i64: 16, 32>}, {pipeline_mode = #tpu.pipeline_mode<synchronous>, transform_indices = @transform_1, window_bounds = array<i64: 128, 32>}, {pipeline_mode = #tpu.pipeline_mode<synchronous>, transform_indices = @transform_2, window_bounds = array<i64: 1, 128>}, {transform_indices = @transform_3, window_bounds = array<i64: 16, 128>}]} {
    %c0 = arith.constant 0 : index
    %c0_0 = arith.constant 0 : index
    %0 = vector.load %arg1[%c0, %c0_0] : memref<16x32xf32, #tpu.memory_space<vmem>>, vector<16x32xf32>
    %c0_1 = arith.constant 0 : index
    %c0_2 = arith.constant 0 : index
    %1 = vector.load %arg2[%c0_1, %c0_2] : memref<128x32xf32, #tpu.memory_space<vmem>>, vector<128x32xf32>
    %cst = arith.constant dense<0.000000e+00> : vector<16x128xf32>
    %2 = tpu.matmul %0, %1, %cst {dimension_numbers = #tpu.dot_dimension_numbers<[1], [1], [0], [0], [0, 0, 1, 0], [], []>} : vector<16x32xf32>, vector<128x32xf32>, vector<16x128xf32> -> vector<16x128xf32>
    %c0_3 = arith.constant 0 : index
    %c0_4 = arith.constant 0 : index
    %3 = vector.load %arg3[%c0_3, %c0_4] : memref<1x128xf32, #tpu.memory_space<vmem>>, vector<1x128xf32>
    %4 = vector.broadcast %3 : vector<1x128xf32> to vector<16x128xf32>
    %5 = arith.addf %2, %4 : vector<16x128xf32>
    %c0_5 = arith.constant 0 : index
    %c0_6 = arith.constant 0 : index
    %6 = vector.load %arg4[%c0_5, %c0_6] : memref<16x128xf32, #tpu.memory_space<vmem>>, vector<16x128xf32>
    tpu.vector_store %arg4[%c0_5, %c0_6], %5 {strides = array<i32>} : memref<16x128xf32, #tpu.memory_space<vmem>>, vector<16x128xf32>,
    return
  }
  func.func @transform_0(%arg0: i32) -> (i32, i32) {
    %c0_i32 = arith.constant 0 : i32
    %c0_i32_0 = arith.constant 0 : i32
    return %arg0, %c0_i32 : i32, i32
  }
  func.func @transform_1(%arg0: i32) -> (i32, i32) {
    %c0_i32 = arith.constant 0 : i32
    %c0_i32_0 = arith.constant 0 : i32
    %c0_i32_1 = arith.constant 0 : i32
    return %c0_i32, %c0_i32_0 : i32, i32
  }
  func.func @transform_2(%arg0: i32) -> (i32, i32) {
    %c0_i32 = arith.constant 0 : i32
    %c0_i32_0 = arith.constant 0 : i32
    %c0_i32_1 = arith.constant 0 : i32
    return %c0_i32, %c0_i32_0 : i32, i32
  }
  func.func @transform_3(%arg0: i32) -> (i32, i32) {
    %c0_i32 = arith.constant 0 : i32
    %c0_i32_0 = arith.constant 0 : i32
    return %arg0, %c0_i32 : i32, i32
  }
}

</mosaic_0001>

<bundles_post_ra>
// kernel: tpu_custom_call.1
= control target key start
LH: loop header
LB: loop body
LE: loop exit
PB: predicated region body
PF: predicated region fallthrough
CT: control target
= control target key end

     0   :  { %vm40_vm0 = vcmask 261120   ;;  %s467_s0 = inlined_call_operand.vmem [shape: f32[16,32], index: 0, kind: input, shape index: {}]   ;;  %s468_s1 = inlined_call_operand.vmem [shape: f32[128,32], index: 1, kind: input, shape index: {}]   ;;  %s469_s2 = inlined_call_operand.vmem [shape: f32[1,128], index: 2, kind: input, shape index: {}]   ;;  %s470_s3 = inlined_call_operand.hbm [shape: f32[16,128], index: 3, kind: output, shape index: {}]  }
   0x1   :  { %v17_v0 = vld [vmem:[%s468_s1] sm:$0xff]  ;;  %v18_v1 = vld [vmem:[%s468_s1 + $0x8] sm:$0xff]  ;;  %v19_v2 = vld [vmem:[%s468_s1 + $0x10] sm:$0xff] }
   0x2   :  { %v260_v3 = vpack.c.bf16 %v18_v1, %v17_v0  ;;  %vm369_vm1 = vmpackc.low %vm40_vm0, %vm40_vm0  ;;  %v20_v5 = vld [vmem:[%s468_s1 + $0x18] sm:$0xff]  ;;  %v15_v7 = vld [vmem:[%s467_s0] sm:$0xff] }
   0x3   :  { %v266_v6 = vpack.c.bf16 %v20_v5, %v19_v2  ;;  %v21_v8 = vld [vmem:[%s468_s1 + $0x20] sm:$0xff]  ;;  %v22_v9 = vld [vmem:[%s468_s1 + $0x28] sm:$0xff]  ;;  %257 = vmatprep.mubr.msk.f32.mxu0 %vm40_vm0, %v15_v7 }
   0x4   :  { %262 = vmatprep.subr.msk.bf16.mxu0 %vm369_vm1, %v260_v3 }
   0x5   :  { %265 = vmatpush3.bf16.xpose.msk.msra.mxu0 %vm369_vm1, %v260_v3 }
   0x6   :  { %268 = vmatprep.subr.msk.bf16.mxu0 %vm369_vm1, %v266_v6 }
   0x7   :  { %8 = vsyncpa [#allocation3], 0  ;;  %v272_v10 = vpack.c.bf16 %v22_v9, %v21_v8  ;;  %v23_v11 = vld [vmem:[%s468_s1 + $0x30] sm:$0xff]  ;;  %v24_v12 = vld [vmem:[%s468_s1 + $0x38] sm:$0xff] }
   0x8   :  { %v278_v13 = vpack.c.bf16 %v24_v12, %v23_v11  ;;  %v25_v14 = vld [vmem:[%s468_s1 + $0x40] sm:$0xff]  ;;  %v26_v15 = vld [vmem:[%s468_s1 + $0x48] sm:$0xff]  ;;  %v27_v17 = vld [vmem:[%s468_s1 + $0x50] sm:$0xff] }
   0x9   :  { %v284_v16 = vpack.c.bf16 %v26_v15, %v25_v14  ;;  %v28_v18 = vld [vmem:[%s468_s1 + $0x58] sm:$0xff]  ;;  %v29_v20 = vld [vmem:[%s468_s1 + $0x60] sm:$0xff]  ;;  %v30_v21 = vld [vmem:[%s468_s1 + $0x68] sm:$0xff] }
   0xa   :  { %v290_v19 = vpack.c.bf16 %v28_v18, %v27_v17  ;;  %v296_v22 = vpack.c.bf16 %v30_v21, %v29_v20  ;;  %v31_v23 = vld [vmem:[%s468_s1 + $0x70] sm:$0xff]  ;;  %v32_v24 = vld [vmem:[%s468_s1 + $0x78] sm:$0xff]  ;;  %v16_v26 = vld [vmem:[%s467_s0 + $0x8] sm:$0xff]  ;;  %s335_s1 = smov [#allocation2]  }
   0xb   :  { %v302_v25 = vpack.c.bf16 %v32_v24, %v31_v23  ;;  %v188_v27 = vld [vmem:[%s469_s2] ss:$0 sm:$0xff]  ;;  %s177_s23 = sshll.u32 %s335_s1, 4  ;;  %s178_s23 = int_to_ptr.vmem [resolvable:$true] %s177_s23 }
   0xc   :  { %s311_s24 = scalar_lea.vmem %s178_s23, 256  ;;  %p316_p1 = scmp.lt.s32.totalorder %s178_s23, %s178_s23 }
   0xd   :  { %271 = vmatpush3.bf16.xpose.msk.msra.mxu0 %vm369_vm1, %v266_v6  ;;  %p312_p0 = scmp.ne.s32.totalorder %s178_s23, %s311_s24  ;;  %p317_p2 = scmp.lt.s32.totalorder %s311_s24, %s311_s24 }
   0xe   :  { %274 = vmatprep.subr.msk.bf16.mxu0 %vm369_vm1, %v272_v10 }
   0xf   :  { %p318_p3 = por %p317_p2, %p316_p1 }
  0x11   :  { %p319_p4 = pnand %p318_p3, %p312_p0 }
  0x15   :  { %277 = vmatpush3.bf16.xpose.msk.msra.mxu0 %vm369_vm1, %v272_v10 }
  0x16   :  { %280 = vmatprep.subr.msk.bf16.mxu0 %vm369_vm1, %v278_v13 }
  0x1d   :  { %283 = vmatpush3.bf16.xpose.msk.msra.mxu0 %vm369_vm1, %v278_v13 }
  0x1e   :  { %286 = vmatprep.subr.msk.bf16.mxu0 %vm369_vm1, %v284_v16 }
  0x25   :  { %289 = vmatpush3.bf16.xpose.msk.msra.mxu0 %vm369_vm1, %v284_v16 }
  0x26   :  { %292 = vmatprep.subr.msk.bf16.mxu0 %vm369_vm1, %v290_v19 }
  0x2d   :  { %295 = vmatpush3.bf16.xpose.msk.msra.mxu0 %vm369_vm1, %v290_v19 }
  0x2e   :  { %298 = vmatprep.subr.msk.bf16.mxu0 %vm369_vm1, %v296_v22 }
  0x35   :  { %301 = vmatpush3.bf16.xpose.msk.msra.mxu0 %vm369_vm1, %v296_v22 }
  0x36   :  { %304 = vmatprep.subr.msk.bf16.mxu0 %vm369_vm1, %v302_v25 }
  0x3d   :  { %307 = vmatpush3.bf16.xpose.msk.msra.mxu0 %vm369_vm1, %v302_v25 }
  0x44   :  { %258 = vmatmul.mubr.msk.f32.vlgmr.msra.gmra.mrb[0].mxu0 %vm40_vm0, %v16_v26 }
 0x117   :  { %v259_v28 = vpop.f32.mrb[0].mxu0 }
 0x118   :  { %v167_v29 = vadd.f32 %v259_v28, %v188_v27  ;;  %v161_v30 = vpop.f32.mrb[1].mxu0 }
 0x119   :  { %v162_v31 = vadd.f32 %v188_v27, %v161_v30 }
 0x11a   :  { %171 = vst [vmem:[#allocation2 + $0x8] sm:$0xff] %v167_v29 }
 0x11b   :  { %170 = vst [vmem:[#allocation2] sm:$0xff] %v162_v31 }
 0x11c   :  { %322 = shalt.err (!%p319_p4)
}
 0x11d   :  { %s323_s2 = scalar_lea.hbm %s470_s3, 256 }
 0x11e   :  { %p324_p5 = scmp.ne.s32.totalorder %s470_s3, %s323_s2  ;;  %p327_p6 = scmp.lt.u32.totalorder %s323_s2, %s470_s3 }
 0x120   :  { %p329_p7 = pnand %p327_p6, %p324_p5 }
 0x122   :  { %332 = shalt.err (!%p329_p7)
}
 0x123   :  { %s336_s30 = smov 128   ;;  %s337_s4 = smov 8  }
 0x124   :  { %183 = dma.vmem_to_hbm [thread:$0]  %s178_s23, 256, %s470_s3, [#allocation3], %s336_s30, %s336_s30, %s337_s4  }
 0x125   :  { %333 = dma.done.wait [#allocation3], 256  }
 0x126   :  { %334 = vsyncadd [#allocation3], 4294967040 }
 0x127   :  { %187 = vsyncpa [#allocation3], 1 }

</bundles_post_ra>
